<compile_context>
chip_gen: v6e
topology: v6e:2x2x1
jax: 0.10.0
libtpu: 0.0.40
codegen_flags: <defaults>
</compile_context>

<pallas_src>
import jax
import jax.numpy as jnp
from jax import lax
from jax.experimental import pallas as pl
from jax.experimental.pallas import tpu as pltpu


OBS_DIM = 4        # e.g. CartPole observation_dim
ACTION_DIM = 2     # e.g. CartPole action_dim (discrete)
H_SHARED = 256     # fc width (folded away on the host)
H_ACTION = 128
H_VALUE = 64
H_HIDDEN = 256     # padded fused hidden width: [128 action | 64 value | 64 zero pad]
OUT_PAD = 128      # lane-dense output slab width

# Packed bias vector layout (tile-aligned lane offsets).
B1_OFF = 0                      # [0, 256)    -> composed hidden bias
BO_OFF = H_HIDDEN               # [256, 384)  -> padded output bias
BIAS_LEN = BO_OFF + OUT_PAD     # 384


def policy_kernel(state_ref, w1_ref, wo_ref, bias_ref, out_ref):
    # Packed biases, static tile-aligned lane slices.
    b1 = bias_ref[:, B1_OFF:B1_OFF + H_HIDDEN]      # (1, 256)
    bo = bias_ref[:, BO_OFF:BO_OFF + OUT_PAD]       # (1, 128)

    s = state_ref[...]                              # (bm, 4)  f32
    w1 = w1_ref[...]                                # (4, 256) f32 (fc folded in)

    # K=4 contraction as 4 VPU broadcast-multiply-adds (no near-empty MXU pass).
    z1 = b1 + s[:, 0:1] * w1[0:1, :]
    for j in range(1, OBS_DIM):
        z1 = z1 + s[:, j:j + 1] * w1[j:j + 1, :]
    h = jnp.maximum(z1, 0.0)                        # fused actor+critic ReLU, (bm, 256)

    # Block-diagonal output layer -> lane-dense slab (bm, 128):
    #   lanes [0, ACTION_DIM) = actor logits, lane ACTION_DIM = state value, rest 0.
    z = jnp.dot(h, wo_ref[...], preferred_element_type=jnp.float32) + bo

    lane = lax.broadcasted_iota(jnp.int32, z.shape, 1)

    if ACTION_DIM == 2:
        # 2-way softmax with pure elementwise VPU/EUP math (no cross-lane reductions).
        l0 = z[:, 0:1]
        l1 = z[:, 1:2]
        m = jnp.maximum(l0, l1)
        e0 = jnp.exp(l0 - m)
        e1 = jnp.exp(l1 - m)
        inv = pl.reciprocal(e0 + e1, approx=False)  # exact: keeps 1e-5 sum-to-1 check
        p0 = e0 * inv
        p1 = e1 * inv
        out = jnp.where(lane == 0, p0, jnp.where(lane == 1, p1, z))
    else:
        # Generic masked softmax over the first ACTION_DIM lanes of the dense slab.
        is_logit = lane < ACTION_DIM
        m = jnp.max(jnp.where(is_logit, z, -jnp.inf), axis=-1, keepdims=True)
        e = jnp.where(is_logit, jnp.exp(z - m), 0.0)
        inv = pl.reciprocal(jnp.sum(e, axis=-1, keepdims=True), approx=False)
        out = jnp.where(is_logit, e * inv, z)

    # Single lane-dense store -> single unmasked writeback DMA.
    out_ref[...] = out


def init_linear(key, fan_in, fan_out):
    """Deterministic init mimicking nn.Linear default: U(-1/sqrt(in), 1/sqrt(in)).
    Weight is returned as (in, out) (transposed vs. PyTorch's (out, in))."""
    kw, kb = jax.random.split(key)
    bound = 1.0 / jnp.sqrt(jnp.float32(fan_in))
    w = jax.random.uniform(kw, (fan_in, fan_out), jnp.float32, -bound, bound)
    b = jax.random.uniform(kb, (1, fan_out), jnp.float32, -bound, bound)
    return w, b


def pack_params(raw_params):
    """Fold fc into the fused hidden layer (f32) and pack into 3 kernel inputs."""
    (w_fc, b_fc, w_a1, b_a1, w_a2, b_a2, w_v1, b_v1, w_v2, b_v2) = raw_params

    # Fused (and lane-padded) hidden layer: [action_fc1 | value_fc1 | 0] -> (256, 256).
    w_h = jnp.zeros((H_SHARED, H_HIDDEN), jnp.float32)
    w_h = w_h.at[:, :H_ACTION].set(w_a1)
    w_h = w_h.at[:, H_ACTION:H_ACTION + H_VALUE].set(w_v1)
    b_h = jnp.zeros((1, H_HIDDEN), jnp.float32)
    b_h = b_h.at[:, :H_ACTION].set(b_a1)
    b_h = b_h.at[:, H_ACTION:H_ACTION + H_VALUE].set(b_v1)

    # Algebraic fold of fc (no activation between fc and the hidden layers).
    w1 = w_fc @ w_h                    # (OBS_DIM, 256) f32
    b1 = b_fc @ w_h + b_h              # (1, 256)       f32

    # Block-diagonal, lane-padded output weight -> (256, 128).
    w_o = jnp.zeros((H_HIDDEN, OUT_PAD), jnp.float32)
    w_o = w_o.at[:H_ACTION, :ACTION_DIM].set(w_a2)
    w_o = w_o.at[H_ACTION:H_ACTION + H_VALUE,
                 ACTION_DIM:ACTION_DIM + 1].set(w_v2)

    # Packed biases: one tile-aligned (1, 384) f32 vector.
    biases = jnp.zeros((1, BIAS_LEN), jnp.float32)
    biases = biases.at[:, B1_OFF:B1_OFF + H_HIDDEN].set(b1)
    biases = biases.at[:, BO_OFF:BO_OFF + ACTION_DIM].set(b_a2)
    biases = biases.at[:, BO_OFF + ACTION_DIM:BO_OFF + ACTION_DIM + 1].set(b_v2)

    return (w1, w_o, biases)


def policy_forward(state, packed_params, *, block_b=2048, min_grid_blocks=2):
    """Runs the fused forward kernel; returns (action_prob, state_value)."""
    w1, w_o, biases = packed_params
    B = state.shape[0]

    # Batch tile: multiple of 8 sublanes; aim for >= min_grid_blocks "parallel"
    # blocks when the batch allows it (both v7x TCs), else a single block.
    Bp8 = ((B + 7) // 8) * 8
    bm = min(block_b, ((pl.cdiv(Bp8, min_grid_blocks) + 7) // 8) * 8)
    n_blocks = pl.cdiv(Bp8, bm)
    Bp = n_blocks * bm
    if Bp != B:
        state = jnp.pad(state, ((0, Bp - B), (0, 0)))

    out = pl.pallas_call(
        policy_kernel,
        out_shape=jax.ShapeDtypeStruct((Bp, OUT_PAD), jnp.float32),
        grid_spec=pltpu.PrefetchScalarGridSpec(
            num_scalar_prefetch=0,
            grid=(n_blocks,),
            in_specs=[
                pl.BlockSpec((bm, OBS_DIM), lambda i: (i, 0)),         # state tile
                pl.BlockSpec((OBS_DIM, H_HIDDEN), lambda i: (0, 0)),   # composed W1
                pl.BlockSpec((H_HIDDEN, OUT_PAD), lambda i: (0, 0)),   # fused output W
                pl.BlockSpec((1, BIAS_LEN), lambda i: (0, 0)),         # packed biases
            ],
            out_specs=pl.BlockSpec((bm, OUT_PAD), lambda i: (i, 0)),
        ),
        compiler_params=pltpu.CompilerParams(
            dimension_semantics=("parallel",),
            vmem_limit_bytes=32 * 1024 * 1024),   # covers v5e's 16 MiB default
    )(state, w1, w_o, biases)

    probs = out[:B, :ACTION_DIM]
    value = out[:B, ACTION_DIM:ACTION_DIM + 1]
    return probs, value


def policy_forward_ref(state, raw_params):
    """Pure-JAX reference mirroring the original, UN-fused PyTorch forward (f32)."""
    (w_fc, b_fc, w_a1, b_a1, w_a2, b_a2, w_v1, b_v1, w_v2, b_v2) = raw_params
    x = state @ w_fc + b_fc
    xa = jnp.maximum(x @ w_a1 + b_a1, 0.0)
    probs = jax.nn.softmax(xa @ w_a2 + b_a2, axis=-1)
    xv = jnp.maximum(x @ w_v1 + b_v1, 0.0)
    value = xv @ w_v2 + b_v2
    return probs, value


if __name__ == "__main__":
    key = jax.random.PRNGKey(0)
    k_state, k1, k2, k3, k4, k5 = jax.random.split(key, 6)

    w_fc, b_fc = init_linear(k1, OBS_DIM, H_SHARED)
    w_a1, b_a1 = init_linear(k2, H_SHARED, H_ACTION)
    w_a2, b_a2 = init_linear(k3, H_ACTION, ACTION_DIM)
    w_v1, b_v1 = init_linear(k4, H_SHARED, H_VALUE)
    w_v2, b_v2 = init_linear(k5, H_VALUE, 1)
    raw_params = (w_fc, b_fc, w_a1, b_a1, w_a2, b_a2, w_v1, b_v1, w_v2, b_v2)
    packed = pack_params(raw_params)

    ok = True
    # Two batch sizes: tiny (grid=(1,)) and one that exercises padding + 2 blocks.
    for B in (8, 50):
        k_state, sub = jax.random.split(k_state)
        state = jax.random.normal(sub, (B, OBS_DIM), jnp.float32)

        action_prob, state_value = policy_forward(state, packed)
        action_prob = jax.block_until_ready(action_prob)
        state_value = jax.block_until_ready(state_value)

        ref_prob, ref_val = policy_forward_ref(state, raw_params)
        ok &= action_prob.shape == (B, ACTION_DIM)
        ok &= state_value.shape == (B, 1)
        ok &= bool(jnp.allclose(action_prob, ref_prob, atol=1e-4, rtol=1e-4))
        ok &= bool(jnp.allclose(state_value, ref_val, atol=1e-4, rtol=1e-4))
        ok &= bool(jnp.allclose(jnp.sum(action_prob, axis=-1), 1.0, atol=1e-5))

    assert ok
    print("KERNEL_OK")
</pallas_src>

<mosaic_0001>
module attributes {stable_mosaic.version = 11 : i64} {
  func.func @policy_kernel(%arg0: i32, %arg1: memref<8x4xf32, #tpu.memory_space<vmem>>, %arg2: memref<4x256xf32, #tpu.memory_space<vmem>>, %arg3: memref<256x128xf32, #tpu.memory_space<vmem>>, %arg4: memref<1x384xf32, #tpu.memory_space<vmem>>, %arg5: memref<8x128xf32, #tpu.memory_space<vmem>>) attributes {dimension_semantics = [#tpu.dimension_semantics<parallel>], iteration_bounds = array<i64: 1>, scalar_prefetch = 0 : i64, scratch_operands = 0 : i64, tpu.core_type = #tpu.core_type<tc>, window_params = [{transform_indices = @transform_0, window_bounds = array<i64: 8, 4>}, {pipeline_mode = #tpu.pipeline_mode<synchronous>, transform_indices = @transform_1, window_bounds = array<i64: 4, 256>}, {pipeline_mode = #tpu.pipeline_mode<synchronous>, transform_indices = @transform_2, window_bounds = array<i64: 256, 128>}, {pipeline_mode = #tpu.pipeline_mode<synchronous>, transform_indices = @transform_3, window_bounds = array<i64: 1, 384>}, {transform_indices = @transform_4, window_bounds = array<i64: 8, 128>}]} {
    %c0 = arith.constant 0 : index
    %c0_0 = arith.constant 0 : index
    %0 = vector.load %arg4[%c0, %c0_0] : memref<1x384xf32, #tpu.memory_space<vmem>>, vector<1x256xf32>
    %c0_1 = arith.constant 0 : index
    %c256 = arith.constant 256 : index
    %1 = vector.load %arg4[%c0_1, %c256] : memref<1x384xf32, #tpu.memory_space<vmem>>, vector<1x128xf32>
    %c0_2 = arith.constant 0 : index
    %c0_3 = arith.constant 0 : index
    %2 = vector.load %arg1[%c0_2, %c0_3] : memref<8x4xf32, #tpu.memory_space<vmem>>, vector<8x4xf32>
    %c0_4 = arith.constant 0 : index
    %c0_5 = arith.constant 0 : index
    %3 = vector.load %arg2[%c0_4, %c0_5] : memref<4x256xf32, #tpu.memory_space<vmem>>, vector<4x256xf32>
    %4 = vector.extract_strided_slice %2 {offsets = [0, 0], sizes = [8, 1], strides = [1, 1]} : vector<8x4xf32> to vector<8x1xf32>
    %5 = vector.extract_strided_slice %3 {offsets = [0, 0], sizes = [1, 256], strides = [1, 1]} : vector<4x256xf32> to vector<1x256xf32>
    %6 = vector.broadcast %4 : vector<8x1xf32> to vector<8x256xf32>
    %7 = vector.broadcast %5 : vector<1x256xf32> to vector<8x256xf32>
    %8 = arith.mulf %6, %7 : vector<8x256xf32>
    %9 = vector.broadcast %0 : vector<1x256xf32> to vector<8x256xf32>
    %10 = arith.addf %9, %8 : vector<8x256xf32>
    %11 = vector.extract_strided_slice %2 {offsets = [0, 1], sizes = [8, 1], strides = [1, 1]} : vector<8x4xf32> to vector<8x1xf32>
    %12 = vector.extract_strided_slice %3 {offsets = [1, 0], sizes = [1, 256], strides = [1, 1]} : vector<4x256xf32> to vector<1x256xf32>
    %13 = vector.broadcast %11 : vector<8x1xf32> to vector<8x256xf32>
    %14 = vector.broadcast %12 : vector<1x256xf32> to vector<8x256xf32>
    %15 = arith.mulf %13, %14 : vector<8x256xf32>
    %16 = arith.addf %10, %15 : vector<8x256xf32>
    %17 = vector.extract_strided_slice %2 {offsets = [0, 2], sizes = [8, 1], strides = [1, 1]} : vector<8x4xf32> to vector<8x1xf32>
    %18 = vector.extract_strided_slice %3 {offsets = [2, 0], sizes = [1, 256], strides = [1, 1]} : vector<4x256xf32> to vector<1x256xf32>
    %19 = vector.broadcast %17 : vector<8x1xf32> to vector<8x256xf32>
    %20 = vector.broadcast %18 : vector<1x256xf32> to vector<8x256xf32>
    %21 = arith.mulf %19, %20 : vector<8x256xf32>
    %22 = arith.addf %16, %21 : vector<8x256xf32>
    %23 = vector.extract_strided_slice %2 {offsets = [0, 3], sizes = [8, 1], strides = [1, 1]} : vector<8x4xf32> to vector<8x1xf32>
    %24 = vector.extract_strided_slice %3 {offsets = [3, 0], sizes = [1, 256], strides = [1, 1]} : vector<4x256xf32> to vector<1x256xf32>
    %25 = vector.broadcast %23 : vector<8x1xf32> to vector<8x256xf32>
    %26 = vector.broadcast %24 : vector<1x256xf32> to vector<8x256xf32>
    %27 = arith.mulf %25, %26 : vector<8x256xf32>
    %28 = arith.addf %22, %27 : vector<8x256xf32>
    %cst = arith.constant 0.000000e+00 : f32
    %29 = vector.broadcast %cst : f32 to vector<8x256xf32>
    %30 = arith.maximumf %28, %29 : vector<8x256xf32>
    %c0_6 = arith.constant 0 : index
    %c0_7 = arith.constant 0 : index
    %31 = vector.load %arg3[%c0_6, %c0_7] : memref<256x128xf32, #tpu.memory_space<vmem>>, vector<256x128xf32>
    %cst_8 = arith.constant dense<0.000000e+00> : vector<8x128xf32>
    %32 = tpu.matmul %30, %31, %cst_8 {dimension_numbers = #tpu.dot_dimension_numbers<[1], [0], [0], [1], [0, 0, 1, 1], [], []>} : vector<8x256xf32>, vector<256x128xf32>, vector<8x128xf32> -> vector<8x128xf32>
    %33 = vector.broadcast %1 : vector<1x128xf32> to vector<8x128xf32>
    %34 = arith.addf %32, %33 : vector<8x128xf32>
    %35 = tpu.iota {dimensions = array<i32: 1>} : vector<8x128xi32>
    %36 = vector.extract_strided_slice %34 {offsets = [0, 0], sizes = [8, 1], strides = [1, 1]} : vector<8x128xf32> to vector<8x1xf32>
    %37 = vector.extract_strided_slice %34 {offsets = [0, 1], sizes = [8, 1], strides = [1, 1]} : vector<8x128xf32> to vector<8x1xf32>
    %38 = arith.maximumf %36, %37 : vector<8x1xf32>
    %39 = arith.subf %36, %38 : vector<8x1xf32>
    %40 = math.exp %39 : vector<8x1xf32>
    %41 = arith.subf %37, %38 : vector<8x1xf32>
    %42 = math.exp %41 : vector<8x1xf32>
    %43 = arith.addf %40, %42 : vector<8x1xf32>
    %44 = tpu.reciprocal %43 : vector<8x1xf32> -> vector<8x1xf32>
    %45 = arith.mulf %40, %44 : vector<8x1xf32>
    %46 = arith.mulf %42, %44 : vector<8x1xf32>
    %c0_i32 = arith.constant 0 : i32
    %47 = vector.broadcast %c0_i32 : i32 to vector<8x128xi32>
    %48 = arith.cmpi eq, %35, %47 : vector<8x128xi32>
    %c1_i32 = arith.constant 1 : i32
    %49 = vector.broadcast %c1_i32 : i32 to vector<8x128xi32>
    %50 = arith.cmpi eq, %35, %49 : vector<8x128xi32>
    %51 = vector.shape_cast %46 : vector<8x1xf32> to vector<8x1xf32>
    %52 = vector.broadcast %51 : vector<8x1xf32> to vector<8x128xf32>
    %53 = arith.select %50, %52, %34 : vector<8x128xi1>, vector<8x128xf32>
    %54 = vector.shape_cast %45 : vector<8x1xf32> to vector<8x1xf32>
    %55 = vector.broadcast %54 : vector<8x1xf32> to vector<8x128xf32>
    %56 = arith.select %48, %55, %53 : vector<8x128xi1>, vector<8x128xf32>
    %c0_9 = arith.constant 0 : index
    %c0_10 = arith.constant 0 : index
    %57 = vector.load %arg5[%c0_9, %c0_10] : memref<8x128xf32, #tpu.memory_space<vmem>>, vector<8x128xf32>
    tpu.vector_store %arg5[%c0_9, %c0_10], %56 {strides = array<i32>} : memref<8x128xf32, #tpu.memory_space<vmem>>, vector<8x128xf32>,
    return
  }
  func.func @transform_0(%arg0: i32) -> (i32, i32) {
    %c0_i32 = arith.constant 0 : i32
    %c0_i32_0 = arith.constant 0 : i32
    return %arg0, %c0_i32 : i32, i32
  }
  func.func @transform_1(%arg0: i32) -> (i32, i32) {
    %c0_i32 = arith.constant 0 : i32
    %c0_i32_0 = arith.constant 0 : i32
    %c0_i32_1 = arith.constant 0 : i32
    return %c0_i32, %c0_i32_0 : i32, i32
  }
  func.func @transform_2(%arg0: i32) -> (i32, i32) {
    %c0_i32 = arith.constant 0 : i32
    %c0_i32_0 = arith.constant 0 : i32
    %c0_i32_1 = arith.constant 0 : i32
    return %c0_i32, %c0_i32_0 : i32, i32
  }
  func.func @transform_3(%arg0: i32) -> (i32, i32) {
    %c0_i32 = arith.constant 0 : i32
    %c0_i32_0 = arith.constant 0 : i32
    %c0_i32_1 = arith.constant 0 : i32
    return %c0_i32, %c0_i32_0 : i32, i32
  }
  func.func @transform_4(%arg0: i32) -> (i32, i32) {
    %c0_i32 = arith.constant 0 : i32
    %c0_i32_0 = arith.constant 0 : i32
    return %arg0, %c0_i32 : i32, i32
  }
}

</mosaic_0001>

<bundles_post_ra>
// kernel: tpu_custom_call.1
= control target key start
LH: loop header
LB: loop body
LE: loop exit
PB: predicated region body
PF: predicated region fallthrough
CT: control target
= control target key end

     0   :  { %9 = vsyncpa [#allocation3], 0  ;;  %s479_s0 = inlined_call_operand.vmem [shape: f32[8,4], index: 0, kind: input, shape index: {}]   ;;  %s480_s1 = inlined_call_operand.vmem [shape: f32[4,256], index: 1, kind: input, shape index: {}]   ;;  %s481_s2 = inlined_call_operand.hbm [shape: f32[256,128], index: 2, kind: input, shape index: {}]   ;;  %s482_s3 = inlined_call_operand.vmem [shape: f32[1,384], index: 3, kind: input, shape index: {}]   ;;  %s483_s4 = inlined_call_operand.hbm [shape: f32[8,128], index: 4, kind: output, shape index: {}]  }
   0x1   :  { %10 = vsyncpa [#allocation4], 0  ;;  %s424_s15 = smov [#allocation2]  }
   0x2   :  { %s20_s16 = sshll.u32 %s424_s15, 4  ;;  %s21_s16 = int_to_ptr.vmem [resolvable:$true] %s20_s16 }
   0x3   :  { %s388_s17 = scalar_lea.vmem %s21_s16, 4096  ;;  %p393_p1 = scmp.lt.s32.totalorder %s21_s16, %s21_s16 }
   0x4   :  { %p389_p0 = scmp.ne.s32.totalorder %s21_s16, %s388_s17  ;;  %p394_p2 = scmp.lt.s32.totalorder %s388_s17, %s388_s17 }
   0x6   :  { %p395_p3 = por %p394_p2, %p393_p1 }
   0x8   :  { %p396_p4 = pnand %p395_p3, %p389_p0 }
   0xa   :  { %399 = shalt.err (!%p396_p4)
}
   0xb   :  { %s425_s18 = smov 128   ;;  %s426_s19 = smov 8  }
   0xc   :  { %26 = dma.hbm_to_vmem [thread:$0]  %s481_s2, 4096, %s21_s16, [#allocation3], %s425_s18, %s425_s18, %s426_s19  }
   0xd   :  { %420 = dma.done.wait [#allocation3], 4096  }
   0xe   :  { %421 = vsyncadd [#allocation3], 4294963200  ;;  %v427_v0 = vmov 0   ;;  %v428_v1 = vmov 2   ;;  %v34_v2 = vld [vmem:[%s479_s0] sm:$0xff]  ;;  %v186_v3 = vld [vmem:[#allocation2 + $0xf8] sm:$0xff]  ;;  %v42_v37 = vlaneseq }
   0xf   :  { %368 = vset.pattern.permute.xlu0 %v427_v0  ;;  %370 = vset.pattern.permute.xlu1 %v428_v1  ;;  %v170_v4 = vld [vmem:[#allocation2 + $0x78] sm:$0xff]  ;;  %v185_v5 = vld [vmem:[#allocation2 + $0xf0] sm:$0xff]  ;;  %v429_v7 = vmov 1   ;;  %v430_v8 = vmov 3   ;;  %v184_v9 = vld [vmem:[#allocation2 + $0xe8] sm:$0xff]  ;;  %s431_s27 = smov 127  }
  0x10   :  { %38 = vperm.xlu0 %368, %v34_v2   ;;  %102 = vperm.xlu1 %370, %v34_v2   ;;  %v169_v6 = vld [vmem:[#allocation2 + $0x70] sm:$0xff]  ;;  %v168_v10 = vld [vmem:[#allocation2 + $0x68] sm:$0xff]  ;;  %v183_v11 = vld [vmem:[#allocation2 + $0xe0] sm:$0xff]  ;;  %v43_v38 = vshrl.u32 %v42_v37, 7  ;;  %s432_s28 = smov 1  }
  0x11   :  { %323 = vmatprep.subr.mxu0 %v186_v3  ;;  %v167_v12 = vld [vmem:[#allocation2 + $0x60] sm:$0xff]  ;;  %v182_v13 = vld [vmem:[#allocation2 + $0xd8] sm:$0xff]  ;;  %v181_v15 = vld [vmem:[#allocation2 + $0xd0] sm:$0xff] }
  0x12   :  { %324 = vmatpush3.msra.mxu0 %v170_v4  ;;  %v166_v14 = vld [vmem:[#allocation2 + $0x58] sm:$0xff]  ;;  %v165_v16 = vld [vmem:[#allocation2 + $0x50] sm:$0xff]  ;;  %v180_v17 = vld [vmem:[#allocation2 + $0xc8] sm:$0xff]  ;;  %v44_v39 = vsub.s32 0, %v43_v38  ;;  %v48_v40 = vsub.s32 4, %v43_v38  ;;  %v69_v44 = vsub.s32 1, %v43_v38 }
  0x13   :  { %325 = vmatprep.subr.mxu0 %v185_v5  ;;  %v164_v18 = vld [vmem:[#allocation2 + $0x48] sm:$0xff]  ;;  %v179_v19 = vld [vmem:[#allocation2 + $0xc0] sm:$0xff]  ;;  %v178_v21 = vld [vmem:[#allocation2 + $0xb8] sm:$0xff]  ;;  %v85_v45 = vsub.s32 5, %v43_v38  ;;  %v107_v46 = vsub.s32 2, %v43_v38  ;;  %v111_v47 = vsub.s32 6, %v43_v38 }
  0x14   :  { %369 = vset.pattern.permute.xlu0 %v429_v7  ;;  %371 = vset.pattern.permute.xlu1 %v430_v8  ;;  %v163_v20 = vld [vmem:[#allocation2 + $0x40] sm:$0xff]  ;;  %v162_v22 = vld [vmem:[#allocation2 + $0x38] sm:$0xff]  ;;  %v177_v23 = vld [vmem:[#allocation2 + $0xb0] sm:$0xff]  ;;  %v133_v48 = vsub.s32 3, %v43_v38  ;;  %v137_v49 = vsub.s32 7, %v43_v38 }
  0x15   :  { %76 = vperm.xlu0 %369, %v34_v2   ;;  %128 = vperm.xlu1 %371, %v34_v2   ;;  %v161_v24 = vld [vmem:[#allocation2 + $0x30] sm:$0xff]  ;;  %v176_v25 = vld [vmem:[#allocation2 + $0xa8] sm:$0xff]  ;;  %v175_v27 = vld [vmem:[#allocation2 + $0xa0] sm:$0xff] }
  0x16   :  { %326 = vmatpush3.msra.mxu0 %v169_v6  ;;  %v160_v26 = vld [vmem:[#allocation2 + $0x28] sm:$0xff]  ;;  %v159_v28 = vld [vmem:[#allocation2 + $0x20] sm:$0xff]  ;;  %v174_v29 = vld [vmem:[#allocation2 + $0x98] sm:$0xff] }
  0x17   :  { %327 = vmatprep.subr.mxu0 %v184_v9  ;;  %v158_v30 = vld [vmem:[#allocation2 + $0x18] sm:$0xff]  ;;  %v173_v31 = vld [vmem:[#allocation2 + $0x90] sm:$0xff]  ;;  %v172_v33 = vld [vmem:[#allocation2 + $0x88] sm:$0xff] }
  0x18   :  { %328 = vmatpush3.msra.mxu0 %v168_v10  ;;  %v157_v32 = vld [vmem:[#allocation2 + $0x10] sm:$0xff]  ;;  %v156_v34 = vld [vmem:[#allocation2 + $0x8] sm:$0xff]  ;;  %v171_v35 = vld [vmem:[#allocation2 + $0x80] sm:$0xff] }
  0x19   :  { %329 = vmatprep.subr.mxu0 %v183_v11  ;;  %373 = vset.pattern.permute.xlu0 %v427_v0  ;;  %v155_v36 = vld [vmem:[#allocation2] sm:$0xff] }
  0x1a   :  { %330 = vmatpush3.msra.mxu0 %v167_v12  ;;  %372 = vset.pattern.permute.xlu1 %v429_v7  ;;  %v35_v41 = vld [vmem:[%s480_s1] sm:$0xff] }
  0x1b   :  { %331 = vmatprep.subr.mxu0 %v182_v13  ;;  %v45_v42 = vrot.slane %v35_v41, %v44_v39  ;;  %v49_v43 = vrot.slane %v35_v41, %v48_v40  ;;  %v32_v52 = vld [vmem:[%s482_s3] sm:$0x3]  ;;  %v82_v53 = vrot.slane %v35_v41, %v69_v44  ;;  %v86_v54 = vrot.slane %v35_v41, %v85_v45 }
  0x1c   :  { %332 = vmatpush3.msra.mxu0 %v166_v14  ;;  %v108_v55 = vrot.slane %v35_v41, %v107_v46  ;;  %v112_v56 = vrot.slane %v35_v41, %v111_v47  ;;  %v134_v59 = vrot.slane %v35_v41, %v133_v48  ;;  %v138_v60 = vrot.slane %v35_v41, %v137_v49 }
  0x1d   :  { %333 = vmatprep.subr.mxu0 %v181_v15  ;;  %v55_v50 = vrot.slane %v45_v42, %v44_v39  ;;  %v59_v51 = vrot.slane %v49_v43, %v44_v39  ;;  %v66_v61 = vrot.slane %v32_v52, %v44_v39  ;;  %v70_v62 = vrot.slane %v32_v52, %v69_v44 }
  0x1e   :  { %334 = vmatpush3.msra.mxu0 %v165_v16  ;;  %v92_v1 = vrot.slane %v82_v53, %v69_v44  ;;  %v96_v2 = vrot.slane %v86_v54, %v69_v44  ;;  %v118_v3 = vrot.slane %v108_v55, %v107_v46  ;;  %v122_v4 = vrot.slane %v112_v56, %v107_v46 }
  0x1f   :  { %335 = vmatprep.subr.mxu0 %v180_v17  ;;  %v144_v5 = vrot.slane %v134_v59, %v133_v48  ;;  %v148_v6 = vrot.slane %v138_v60, %v133_v48  ;;  %v264_v46 = vand.u32 127, %v42_v37 }
  0x20   :  { %336 = vmatpush3.msra.mxu0 %v164_v18 }
  0x21   :  { %337 = vmatprep.subr.mxu0 %v179_v19  ;;  %vm293_vm0 = vcmp.eq.s32.totalorder %v264_v46, 1  ;;  %vm292_vm1 = vcmp.eq.s32.totalorder %v264_v46, 0 }
  0x22   :  { %338 = vmatpush3.msra.mxu0 %v163_v20 }
  0x23   :  { %339 = vmatprep.subr.mxu0 %v178_v21 }
  0x24   :  { %340 = vmatpush3.msra.mxu0 %v162_v22 }
  0x25   :  { %341 = vmatprep.subr.mxu0 %v177_v23 }
  0x26   :  { %342 = vmatpush3.msra.mxu0 %v161_v24 }
  0x27   :  { %343 = vmatprep.subr.mxu0 %v176_v25 }
  0x28   :  { %344 = vmatpush3.msra.mxu0 %v160_v26  ;;  %v322_v26 = vld [vmem:[%s482_s3 + $0x2] ss:$0 sm:$0xff]  ;;  %s433_s3 = smov [#allocation5]  }
  0x29   :  { %345 = vmatprep.subr.mxu0 %v175_v27  ;;  %s313_s29 = sshll.u32 %s433_s3, 4  ;;  %s314_s29 = int_to_ptr.vmem [resolvable:$true] %s313_s29 }
  0x2a   :  { %346 = vmatpush3.msra.mxu0 %v159_v28  ;;  %s400_s30 = scalar_lea.vmem %s314_s29, 128  ;;  %p405_p6 = scmp.lt.s32.totalorder %s314_s29, %s314_s29 }
  0x2b   :  { %347 = vmatprep.subr.mxu0 %v174_v29  ;;  %p401_p5 = scmp.ne.s32.totalorder %s314_s29, %s400_s30  ;;  %p406_p7 = scmp.lt.s32.totalorder %s400_s30, %s400_s30 }
  0x2c   :  { %348 = vmatpush3.msra.mxu0 %v158_v30 }
  0x2d   :  { %349 = vmatprep.subr.mxu0 %v173_v31  ;;  %p407_p8 = por %p406_p7, %p405_p6 }
  0x2e   :  { %350 = vmatpush3.msra.mxu0 %v157_v32 }
  0x2f   :  { %351 = vmatprep.subr.mxu0 %v172_v33  ;;  %p408_p9 = pnand %p407_p8, %p401_p5 }
  0x30   :  { %352 = vmatpush3.msra.mxu0 %v156_v34 }
  0x31   :  { %353 = vmatprep.subr.mxu0 %v171_v35 }
  0x32   :  { %354 = vmatpush3.msra.mxu0 %v155_v36 }
  0x8b   :  { %v39_v57 = vpop.permute.xlu0 %38  ;;  %v103_v58 = vpop.permute.xlu1 %102 }
  0x8c   :  { %v60_v63 = vmul.f32 %v55_v50, %v39_v57  ;;  %v61_v0 = vmul.f32 %v59_v51, %v39_v57  ;;  %v123_v13 = vmul.f32 %v118_v3, %v103_v58  ;;  %v124_v14 = vmul.f32 %v122_v4, %v103_v58 }
  0x8e   :  { %v73_v9 = vadd.f32 %v66_v61, %v60_v63  ;;  %v74_v10 = vadd.f32 %v70_v62, %v61_v0 }
  0x90   :  { %v77_v7 = vpop.permute.xlu0 %76  ;;  %v129_v8 = vpop.permute.xlu1 %128 }
  0x91   :  { %v97_v11 = vmul.f32 %v92_v1, %v77_v7  ;;  %v98_v12 = vmul.f32 %v96_v2, %v77_v7  ;;  %v149_v17 = vmul.f32 %v144_v5, %v129_v8  ;;  %v150_v18 = vmul.f32 %v148_v6, %v129_v8 }
  0x93   :  { %v99_v15 = vadd.f32 %v97_v11, %v73_v9  ;;  %v100_v16 = vadd.f32 %v98_v12, %v74_v10 }
  0x95   :  { %v125_v19 = vadd.f32 %v123_v13, %v99_v15  ;;  %v126_v20 = vadd.f32 %v124_v14, %v100_v16 }
  0x97   :  { %v151_v21 = vadd.f32 %v149_v17, %v125_v19  ;;  %v152_v22 = vadd.f32 %v150_v18, %v126_v20 }
  0x99   :  { %v154_v23 = vmax.f32 %v152_v22, 0.0  ;;  %v153_v24 = vmax.f32 %v151_v21, 0.0 }
  0x9b   :  { %257 = vmatprep.mubr.f32.mxu0 %v154_v23 }
  0x9c   :  { %258 = vmatmul.mubr.f32.vlgmr.msra.gmra.mxu0 %v153_v24 }
 0x15c   :  { %v355_v25 = vpop.f32.mrf.mxu0 }
 0x15e   :  { %v356_v27 = vpop.f32.mrf.mxu0 }
 0x15f   :  { %v357_v28 = vadd.f32 %v356_v27, %v355_v25 }
 0x161   :  { %v260_v29 = vadd.f32 %v357_v28, %v322_v26 }
 0x163   :  { %266 = vrot.lane.b32.xlu1 %v260_v29, %s431_s27 }
 0x1d5   :  { %v267_v30 = vpop.permute.xlu1 %266 }
 0x1d6   :  { %v269_v31 = vmax.f32 %v260_v29, %v267_v30 }
 0x1d8   :  { %274 = vrot.lane.b32.xlu0 %v269_v31, %s432_s28  ;;  %v270_v36 = vsub.f32 %v260_v29, %v269_v31 }
 0x1da   :  { %v271_v38 = vmul.f32 1.442695, %v270_v36 }
 0x24a   :  { %v275_v32 = vpop.permute.xlu0 %274 }
 0x24b   :  { %v277_v33 = vsub.f32 %v260_v29, %v275_v32 }
 0x24d   :  { %v278_v34 = vmul.f32 1.442695, %v277_v33 }
 0x24f   :  { %374 = vpow2.f32 %v278_v34 }
 0x250   :  { %376 = vpow2.f32 %v271_v38 }
 0x25c   :  { %v375_v35 = vpop.eup %374 }
 0x25d   :  { %281 = vrot.lane.b32.xlu1 %v375_v35, %s431_s27  ;;  %v377_v39 = vpop.eup %376 }
 0x2cf   :  { %v282_v40 = vpop.permute.xlu1 %281 }
 0x2d0   :  { %v284_v41 = vadd.f32 %v377_v39, %v282_v40 }
 0x2d2   :  { %378 = vrcp.f32 %v284_v41 }
 0x2df   :  { %v379_v42 = vpop.eup %378 }
 0x2e0   :  { %288 = vrot.lane.b32.xlu0 %v379_v42, %s432_s28  ;;  %v286_v43 = vmul.f32 %v379_v42, %v377_v39 }
 0x2e4   :  { %302 = vperm.xlu0 %373, %v286_v43  }
 0x352   :  { %v289_v44 = vpop.permute.xlu0 %288 }
 0x353   :  { %v291_v45 = vmul.f32 %v375_v35, %v289_v44 }
 0x355   :  { %296 = vperm.xlu1 %372, %v291_v45  }
 0x35f   :  { %v303_v48 = vpop.permute.xlu0 %302 }
 0x3d0   :  { %v297_v47 = vpop.permute.xlu1 %296 }
 0x3d1   :  { %v299_v49 = vsel %vm293_vm0, %v297_v47, %v260_v29 }
 0x3d2   :  { %v305_v50 = vsel %vm292_vm1, %v303_v48, %v299_v49 }
 0x3d3   :  { %306 = vst [vmem:[#allocation5] sm:$0xff] %v305_v50 }
 0x3d4   :  { %411 = shalt.err (!%p408_p9)
}
 0x3d5   :  { %316 = dma.vmem_to_hbm [thread:$0]  %s314_s29, 128, %s483_s4, [#allocation4]  }
 0x3d6   :  { %422 = dma.done.wait [#allocation4], 128  }
 0x3d7   :  { %423 = vsyncadd [#allocation4], 4294967168 }
 0x3d8   :  { %320 = vsyncpa [#allocation3], 1 }
 0x3d9   :  { %321 = vsyncpa [#allocation4], 1 }

</bundles_post_ra>
